<compile_context>
chip_gen: v7x
topology: tpu7x:2x2x1
jax: 0.10.0
libtpu: 0.0.40
codegen_flags: <defaults>
</compile_context>

<pallas_src>
import functools

import jax
import jax.numpy as jnp
from jax.experimental import pallas as pl
from jax.experimental.pallas import tpu as pltpu

_LANE = 128     # lane width (last-dim alignment)
_SUBLANE = 8    # sublane width (second-to-last-dim alignment)


def _round_up(x, m):
    return (x + m - 1) // m * m


def _mlp_kernel(*refs, n_layers):
    # refs = (x_ref, w0_ref, b0_ref, w1_ref, b1_ref, ..., o_ref)
    x_ref, o_ref = refs[0], refs[-1]
    params = refs[1:-1]

    h = x_ref[...]                                   # (TB, D0_pad) f32
    for j in range(n_layers):
        w = params[2 * j][...]                       # (Dj_pad, Dj+1_pad) lane-dense RHS
        b = params[2 * j + 1][...]                   # (1, Dj+1_pad) broadcast over sublanes
        h = jnp.dot(h, w, preferred_element_type=jnp.float32) + b
        if j != n_layers - 1:
            h = jnp.tanh(h)                          # EUP; last layer has no activation
    o_ref[...] = h.astype(o_ref.dtype)


def dense_net_forward(x, params, *, batch_tile=512):
    """Fused DenseNet forward.  x: [B, Din] f32; params: list of (W [out,in], b [out])."""
    B, Din = x.shape
    n_layers = len(params)
    assert n_layers >= 1

    # Feature sizes per layer boundary, padded to lane width.
    dims = [Din] + [w.shape[0] for w, _ in params]
    dims_pad = [_round_up(d, _LANE) for d in dims]

    # --- choose batch tile: big tiles amortize per-grid-step overhead (~0.35us),
    # but must fit VMEM alongside the resident params.  Shrink for tiny batches.
    param_bytes = sum((dims_pad[j] * dims_pad[j + 1] + dims_pad[j + 1]) * 4
                      for j in range(n_layers))
    max_feat = max(dims_pad)

    def footprint(tb):
        # double-buffered input/output tiles + params + worst-case activation + slack
        io = 2 * tb * (dims_pad[0] + dims_pad[-1]) * 4
        act = 2 * tb * max_feat * 4
        return io + param_bytes + act

    batch_tile = min(batch_tile, _round_up(B, _SUBLANE))
    batch_tile = _round_up(batch_tile, _SUBLANE)
    vmem_budget = 100 * 1024 * 1024          # leave headroom under 128 MiB (64 MiB on v7x/2)
    while batch_tile > _SUBLANE and footprint(batch_tile) > vmem_budget:
        batch_tile //= 2
        batch_tile = _round_up(batch_tile, _SUBLANE)
    B_pad = _round_up(B, batch_tile)

    # Zero-pad input (padded rows/cols are zero; sliced off at the end).
    x_p = jnp.pad(x, ((0, B_pad - B), (0, dims_pad[0] - Din)))

    flat_params = []
    in_specs = [pl.BlockSpec((batch_tile, dims_pad[0]), lambda i: (i, 0))]
    for j, (w, b) in enumerate(params):
        dout, din = w.shape
        assert din == dims[j] and dout == dims[j + 1]
        # Pre-transpose to [Din, Dout] and zero-pad -> lane-dense RHS, exact math.
        wt = jnp.pad(w.T, ((0, dims_pad[j] - din), (0, dims_pad[j + 1] - dout)))
        bp = jnp.pad(b, (0, dims_pad[j + 1] - dout)).reshape(1, dims_pad[j + 1])
        flat_params += [wt, bp]
        in_specs += [
            pl.BlockSpec((dims_pad[j], dims_pad[j + 1]), lambda i: (0, 0)),
            pl.BlockSpec((1, dims_pad[j + 1]), lambda i: (0, 0)),
        ]

    # Advisory cost estimate for XLA's scheduler around the custom call.
    flops = sum(2 * B_pad * dims_pad[j] * dims_pad[j + 1] for j in range(n_layers))
    transcendentals = sum(B_pad * dims_pad[j + 1] for j in range(n_layers - 1))
    bytes_accessed = (B_pad * dims_pad[0] + B_pad * dims_pad[-1]) * 4 + param_bytes

    kernel = functools.partial(_mlp_kernel, n_layers=n_layers)
    out_p = pl.pallas_call(
        kernel,
        out_shape=jax.ShapeDtypeStruct((B_pad, dims_pad[-1]), x.dtype),
        grid=(B_pad // batch_tile,),
        in_specs=in_specs,
        out_specs=pl.BlockSpec((batch_tile, dims_pad[-1]), lambda i: (i, 0)),
        compiler_params=pltpu.CompilerParams(
            dimension_semantics=("parallel",),          # batch grid shards across TCs (v7x)
            vmem_limit_bytes=min(footprint(batch_tile) + (8 << 20), 128 << 20),
        ),
        cost_estimate=pl.CostEstimate(
            flops=flops,
            transcendentals=transcendentals,
            bytes_accessed=bytes_accessed,
        ),
    )(x_p, *flat_params)

    return out_p[:B, : dims[-1]]


def init_dense_net_params(key, layers):
    """Deterministic init mimicking nn.Linear's default (uniform +/- 1/sqrt(fan_in))."""
    params = []
    for j in range(len(layers) - 1):
        fan_in, fan_out = layers[j], layers[j + 1]
        key, kw, kb = jax.random.split(key, 3)
        bound = 1.0 / jnp.sqrt(fan_in)
        w = jax.random.uniform(kw, (fan_out, fan_in), jnp.float32, -bound, bound)
        b = jax.random.uniform(kb, (fan_out,), jnp.float32, -bound, bound)
        params.append((w, b))
    return params
    # TODO(synk): normalize=True (BatchNorm1d) branch not implemented; module used with default False.


if __name__ == "__main__":
    key = jax.random.PRNGKey(0)
    layers = [32, 64, 64, 16]     # DenseNet(layers, nonlinearity='tanh')
    batch = 8

    kx, kp = jax.random.split(key)
    x = jax.random.normal(kx, (batch, layers[0]), jnp.float32)
    params = init_dense_net_params(kp, layers)

    out = dense_net_forward(x, params)
    out = jax.block_until_ready(out)

    # sanity check against plain-JAX reference (PyTorch nn.Linear semantics)
    ref = x
    for j, (w, b) in enumerate(params):
        ref = ref @ w.T + b
        if j != len(params) - 1:
            ref = jnp.tanh(ref)
    assert out.shape == (batch, layers[-1])
    assert jnp.allclose(out, ref, atol=1e-5, rtol=1e-5)

    print("KERNEL_OK")
</pallas_src>

<mosaic_0001>
module attributes {stable_mosaic.version = 11 : i64} {
  func.func @_mlp_kernel(%arg0: i32, %arg1: memref<8x128xf32, #tpu.memory_space<vmem>>, %arg2: memref<128x128xf32, #tpu.memory_space<vmem>>, %arg3: memref<1x128xf32, #tpu.memory_space<vmem>>, %arg4: memref<128x128xf32, #tpu.memory_space<vmem>>, %arg5: memref<1x128xf32, #tpu.memory_space<vmem>>, %arg6: memref<128x128xf32, #tpu.memory_space<vmem>>, %arg7: memref<1x128xf32, #tpu.memory_space<vmem>>, %arg8: memref<8x128xf32, #tpu.memory_space<vmem>>) attributes {dimension_semantics = [#tpu.dimension_semantics<parallel>], iteration_bounds = array<i64: 1>, scalar_prefetch = 0 : i64, scratch_operands = 0 : i64, tpu.core_type = #tpu.core_type<tc>, window_params = [{transform_indices = @transform_0, window_bounds = array<i64: 8, 128>}, {pipeline_mode = #tpu.pipeline_mode<synchronous>, transform_indices = @transform_1, window_bounds = array<i64: 128, 128>}, {pipeline_mode = #tpu.pipeline_mode<synchronous>, transform_indices = @transform_2, window_bounds = array<i64: 1, 128>}, {pipeline_mode = #tpu.pipeline_mode<synchronous>, transform_indices = @transform_3, window_bounds = array<i64: 128, 128>}, {pipeline_mode = #tpu.pipeline_mode<synchronous>, transform_indices = @transform_4, window_bounds = array<i64: 1, 128>}, {pipeline_mode = #tpu.pipeline_mode<synchronous>, transform_indices = @transform_5, window_bounds = array<i64: 128, 128>}, {pipeline_mode = #tpu.pipeline_mode<synchronous>, transform_indices = @transform_6, window_bounds = array<i64: 1, 128>}, {transform_indices = @transform_7, window_bounds = array<i64: 8, 128>}]} {
    %c0 = arith.constant 0 : index
    %c0_0 = arith.constant 0 : index
    %0 = vector.load %arg1[%c0, %c0_0] : memref<8x128xf32, #tpu.memory_space<vmem>>, vector<8x128xf32>
    %c0_1 = arith.constant 0 : index
    %c0_2 = arith.constant 0 : index
    %1 = vector.load %arg2[%c0_1, %c0_2] : memref<128x128xf32, #tpu.memory_space<vmem>>, vector<128x128xf32>
    %c0_3 = arith.constant 0 : index
    %c0_4 = arith.constant 0 : index
    %2 = vector.load %arg3[%c0_3, %c0_4] : memref<1x128xf32, #tpu.memory_space<vmem>>, vector<1x128xf32>
    %cst = arith.constant dense<0.000000e+00> : vector<8x128xf32>
    %3 = tpu.matmul %0, %1, %cst {dimension_numbers = #tpu.dot_dimension_numbers<[1], [0], [0], [1], [0, 0, 1, 1], [], []>} : vector<8x128xf32>, vector<128x128xf32>, vector<8x128xf32> -> vector<8x128xf32>
    %4 = vector.broadcast %2 : vector<1x128xf32> to vector<8x128xf32>
    %5 = arith.addf %3, %4 : vector<8x128xf32>
    %6 = math.tanh %5 : vector<8x128xf32>
    %c0_5 = arith.constant 0 : index
    %c0_6 = arith.constant 0 : index
    %7 = vector.load %arg4[%c0_5, %c0_6] : memref<128x128xf32, #tpu.memory_space<vmem>>, vector<128x128xf32>
    %c0_7 = arith.constant 0 : index
    %c0_8 = arith.constant 0 : index
    %8 = vector.load %arg5[%c0_7, %c0_8] : memref<1x128xf32, #tpu.memory_space<vmem>>, vector<1x128xf32>
    %cst_9 = arith.constant dense<0.000000e+00> : vector<8x128xf32>
    %9 = tpu.matmul %6, %7, %cst_9 {dimension_numbers = #tpu.dot_dimension_numbers<[1], [0], [0], [1], [0, 0, 1, 1], [], []>} : vector<8x128xf32>, vector<128x128xf32>, vector<8x128xf32> -> vector<8x128xf32>
    %10 = vector.broadcast %8 : vector<1x128xf32> to vector<8x128xf32>
    %11 = arith.addf %9, %10 : vector<8x128xf32>
    %12 = math.tanh %11 : vector<8x128xf32>
    %c0_10 = arith.constant 0 : index
    %c0_11 = arith.constant 0 : index
    %13 = vector.load %arg6[%c0_10, %c0_11] : memref<128x128xf32, #tpu.memory_space<vmem>>, vector<128x128xf32>
    %c0_12 = arith.constant 0 : index
    %c0_13 = arith.constant 0 : index
    %14 = vector.load %arg7[%c0_12, %c0_13] : memref<1x128xf32, #tpu.memory_space<vmem>>, vector<1x128xf32>
    %cst_14 = arith.constant dense<0.000000e+00> : vector<8x128xf32>
    %15 = tpu.matmul %12, %13, %cst_14 {dimension_numbers = #tpu.dot_dimension_numbers<[1], [0], [0], [1], [0, 0, 1, 1], [], []>} : vector<8x128xf32>, vector<128x128xf32>, vector<8x128xf32> -> vector<8x128xf32>
    %16 = vector.broadcast %14 : vector<1x128xf32> to vector<8x128xf32>
    %17 = arith.addf %15, %16 : vector<8x128xf32>
    %c0_15 = arith.constant 0 : index
    %c0_16 = arith.constant 0 : index
    %18 = vector.load %arg8[%c0_15, %c0_16] : memref<8x128xf32, #tpu.memory_space<vmem>>, vector<8x128xf32>
    tpu.vector_store %arg8[%c0_15, %c0_16], %17 {strides = array<i32>} : memref<8x128xf32, #tpu.memory_space<vmem>>, vector<8x128xf32>,
    return
  }
  func.func @transform_0(%arg0: i32) -> (i32, i32) {
    %c0_i32 = arith.constant 0 : i32
    %c0_i32_0 = arith.constant 0 : i32
    return %arg0, %c0_i32 : i32, i32
  }
  func.func @transform_1(%arg0: i32) -> (i32, i32) {
    %c0_i32 = arith.constant 0 : i32
    %c0_i32_0 = arith.constant 0 : i32
    %c0_i32_1 = arith.constant 0 : i32
    return %c0_i32, %c0_i32_0 : i32, i32
  }
  func.func @transform_2(%arg0: i32) -> (i32, i32) {
    %c0_i32 = arith.constant 0 : i32
    %c0_i32_0 = arith.constant 0 : i32
    %c0_i32_1 = arith.constant 0 : i32
    return %c0_i32, %c0_i32_0 : i32, i32
  }
  func.func @transform_3(%arg0: i32) -> (i32, i32) {
    %c0_i32 = arith.constant 0 : i32
    %c0_i32_0 = arith.constant 0 : i32
    %c0_i32_1 = arith.constant 0 : i32
    return %c0_i32, %c0_i32_0 : i32, i32
  }
  func.func @transform_4(%arg0: i32) -> (i32, i32) {
    %c0_i32 = arith.constant 0 : i32
    %c0_i32_0 = arith.constant 0 : i32
    %c0_i32_1 = arith.constant 0 : i32
    return %c0_i32, %c0_i32_0 : i32, i32
  }
  func.func @transform_5(%arg0: i32) -> (i32, i32) {
    %c0_i32 = arith.constant 0 : i32
    %c0_i32_0 = arith.constant 0 : i32
    %c0_i32_1 = arith.constant 0 : i32
    return %c0_i32, %c0_i32_0 : i32, i32
  }
  func.func @transform_6(%arg0: i32) -> (i32, i32) {
    %c0_i32 = arith.constant 0 : i32
    %c0_i32_0 = arith.constant 0 : i32
    %c0_i32_1 = arith.constant 0 : i32
    return %c0_i32, %c0_i32_0 : i32, i32
  }
  func.func @transform_7(%arg0: i32) -> (i32, i32) {
    %c0_i32 = arith.constant 0 : i32
    %c0_i32_0 = arith.constant 0 : i32
    return %arg0, %c0_i32 : i32, i32
  }
}

</mosaic_0001>

<bundles_post_ra>
// kernel: tpu_custom_call.1
= control target key start
LH: loop header
LB: loop body
LE: loop exit
PB: predicated region body
PF: predicated region fallthrough
CT: control target
= control target key end

     0   :  { %12 = vsyncpa [#allocation3], 0  ;;  %s901_s0 = inlined_call_operand.hbm [shape: f32[8,128], index: 0, kind: input, shape index: {}]   ;;  %s902_s1 = inlined_call_operand.hbm [shape: f32[128,128], index: 1, kind: input, shape index: {}]   ;;  %s903_s2 = inlined_call_operand.vmem [shape: f32[1,128], index: 2, kind: input, shape index: {}]   ;;  %s904_s3 = inlined_call_operand.hbm [shape: f32[128,128], index: 3, kind: input, shape index: {}]   ;;  %s905_s4 = inlined_call_operand.vmem [shape: f32[1,128], index: 4, kind: input, shape index: {}]   ;;  %s906_s5 = inlined_call_operand.hbm [shape: f32[128,128], index: 5, kind: input, shape index: {}]   ;;  %s907_s6 = inlined_call_operand.vmem [shape: f32[1,128], index: 6, kind: input, shape index: {}]   ;;  %s908_s7 = inlined_call_operand.hbm [shape: f32[8,128], index: 7, kind: output, shape index: {}]  }
   0x1   :  { %13 = vsyncpa [#allocation6], 0 }
   0x2   :  { %14 = vsyncpa [#allocation9], 0 }
   0x3   :  { %15 = vsyncpa [#allocation4], 0  ;;  %s743_s24 = smov [#allocation5]   ;;  %s625_s28 = scalar_lea.hbm %s902_s1, 2048 }
   0x4   :  { %s31_s25 = sshll.u32 %s743_s24, 4  ;;  %p626_p0 = scmp.ne.s32.totalorder %s902_s1, %s625_s28  ;;  %s32_s25 = int_to_ptr.vmem [resolvable:$true] %s31_s25 }
   0x5   :  { %p629_p1 = scmp.lt.u32.totalorder %s625_s28, %s902_s1 }
   0x7   :  { %p631_p2 = pnand %p629_p1, %p626_p0 }
   0x9   :  { %634 = shalt.err (!%p631_p2)
}
   0xa   :  { %s635_s10 = scalar_lea.vmem %s32_s25, 2048  ;;  %p640_p4 = scmp.lt.s32.totalorder %s32_s25, %s32_s25 }
   0xb   :  { %p636_p3 = scmp.ne.s32.totalorder %s32_s25, %s635_s10  ;;  %p641_p5 = scmp.lt.s32.totalorder %s635_s10, %s635_s10 }
   0xd   :  { %p642_p6 = por %p641_p5, %p640_p4 }
   0xf   :  { %p643_p7 = pnand %p642_p6, %p636_p3 }
  0x11   :  { %646 = shalt.err (!%p643_p7)
}
  0x12   :  { %s744_s11 = smov 128   ;;  %s745_s12 = smov 8  }
  0x13   :  { %37 = dma.hbm_to_vmem [thread:$0]  %s902_s1, 2048, %s32_s25, [#allocation6], %s744_s11, %s744_s11, %s745_s12  }
  0x14   :  { %s746_s15 = smov [#allocation2]   ;;  %s747_s17 = smov [#allocation7]  }
  0x15   :  { %s22_s16 = sshll.u32 %s746_s15, 4  ;;  %s45_s18 = sshll.u32 %s747_s17, 4  ;;  %s23_s16 = int_to_ptr.vmem [resolvable:$true] %s22_s16  ;;  %s46_s18 = int_to_ptr.vmem [resolvable:$true] %s45_s18 }
  0x16   :  { %s647_s21 = scalar_lea.hbm %s901_s0, 128 }
  0x17   :  { %p648_p8 = scmp.ne.s32.totalorder %s901_s0, %s647_s21  ;;  %p651_p9 = scmp.lt.u32.totalorder %s647_s21, %s901_s0 }
  0x19   :  { %p653_p10 = pnand %p651_p9, %p648_p8 }
  0x1b   :  { %656 = shalt.err (!%p653_p10)
}
  0x1c   :  { %s657_s1 = scalar_lea.vmem %s23_s16, 128  ;;  %p662_p12 = scmp.lt.s32.totalorder %s23_s16, %s23_s16 }
  0x1d   :  { %p658_p11 = scmp.ne.s32.totalorder %s23_s16, %s657_s1  ;;  %p663_p13 = scmp.lt.s32.totalorder %s657_s1, %s657_s1 }
  0x1f   :  { %p664_p0 = por %p663_p13, %p662_p12 }
  0x21   :  { %p665_p1 = pnand %p664_p0, %p658_p11 }
  0x23   :  { %668 = shalt.err (!%p665_p1)
}
  0x24   :  { %25 = dma.hbm_to_vmem [thread:$0]  %s901_s0, 128, %s23_s16, [#allocation3]  }
  0x25   :  { %s669_s30 = scalar_lea.hbm %s904_s3, 2048 }
  0x26   :  { %p670_p2 = scmp.ne.s32.totalorder %s904_s3, %s669_s30  ;;  %p673_p3 = scmp.lt.u32.totalorder %s669_s30, %s904_s3 }
  0x28   :  { %p675_p4 = pnand %p673_p3, %p670_p2 }
  0x2a   :  { %678 = shalt.err (!%p675_p4)
}
  0x2b   :  { %s679_s14 = scalar_lea.vmem %s46_s18, 2048  ;;  %p684_p6 = scmp.lt.s32.totalorder %s46_s18, %s46_s18 }
  0x2c   :  { %p680_p5 = scmp.ne.s32.totalorder %s46_s18, %s679_s14  ;;  %p685_p7 = scmp.lt.s32.totalorder %s679_s14, %s679_s14 }
  0x2e   :  { %p686_p8 = por %p685_p7, %p684_p6 }
  0x30   :  { %p687_p9 = pnand %p686_p8, %p680_p5 }
  0x32   :  { %690 = shalt.err (!%p687_p9)
}
  0x33   :  { %51 = dma.hbm_to_vmem [thread:$0]  %s904_s3, 2048, %s46_s18, [#allocation6], %s744_s11, %s744_s11, %s745_s12  }
  0x34   :  { %s748_s16 = smov [#allocation8]   ;;  %s691_s21 = scalar_lea.hbm %s906_s5, 2048 }
  0x35   :  { %s59_s17 = sshll.u32 %s748_s16, 4  ;;  %p692_p10 = scmp.ne.s32.totalorder %s906_s5, %s691_s21  ;;  %s60_s17 = int_to_ptr.vmem [resolvable:$true] %s59_s17 }
  0x36   :  { %p695_p11 = scmp.lt.u32.totalorder %s691_s21, %s906_s5 }
  0x38   :  { %p697_p12 = pnand %p695_p11, %p692_p10 }
  0x3a   :  { %700 = shalt.err (!%p697_p12)
}
  0x3b   :  { %s701_s1 = scalar_lea.vmem %s60_s17, 2048  ;;  %p706_p0 = scmp.lt.s32.totalorder %s60_s17, %s60_s17 }
  0x3c   :  { %p702_p13 = scmp.ne.s32.totalorder %s60_s17, %s701_s1  ;;  %p707_p1 = scmp.lt.s32.totalorder %s701_s1, %s701_s1 }
  0x3e   :  { %p708_p2 = por %p707_p1, %p706_p0 }
  0x40   :  { %p709_p3 = pnand %p708_p2, %p702_p13 }
  0x42   :  { %712 = shalt.err (!%p709_p3)
}
  0x43   :  { %65 = dma.hbm_to_vmem [thread:$0]  %s906_s5, 2048, %s60_s17, [#allocation9], %s744_s11, %s744_s11, %s745_s12  }
  0x44   :  { %735 = dma.done.wait [#allocation3], 128  }
  0x45   :  { %736 = vsyncadd [#allocation3], 4294967168 }
  0x46   :  { %737 = dma.done.wait [#allocation6], 4096  }
  0x47   :  { %738 = vsyncadd [#allocation6], 4294963200 }
  0x48   :  { %739 = dma.done.wait [#allocation9], 2048  }
  0x49   :  { %740 = vsyncadd [#allocation9], 4294965248  ;;  %v749_v0 = vmov 0.0|0.0   ;;  %vm750_vm0 = vmmov 0   ;;  %v751_v1 = vmov 0.0   ;;  %v81_v2 = vld [vmem:[#allocation5] sm:$0xff] }
  0x4a   :  { %539 = vmatprep.subr.bf16.mxu0 %v749_v0  ;;  %466 = vmatprep.mubr.msk.f32.mxu0 %vm750_vm0, %v751_v1  ;;  %v82_v3 = vld [vmem:[#allocation5 + $0x8] sm:$0xff]  ;;  %v83_v4 = vld [vmem:[#allocation5 + $0x10] sm:$0xff]  ;;  %v84_v6 = vld [vmem:[#allocation5 + $0x18] sm:$0xff]  ;;  %s752_s28 = smov [#allocation10]  }
  0x4b   :  { %563 = vmatprep.subr.bf16.mxu1 %v749_v0  ;;  %501 = vmatprep.mubr.msk.f32.mxu1 %vm750_vm0, %v751_v1  ;;  %v540_v5 = vpack.c.bf16 %v82_v3, %v81_v2  ;;  %v543_v7 = vpack.c.bf16 %v84_v6, %v83_v4  ;;  %v85_v8 = vld [vmem:[#allocation5 + $0x20] sm:$0xff]  ;;  %v86_v9 = vld [vmem:[#allocation5 + $0x28] sm:$0xff]  ;;  %v177_v12 = vld [vmem:[#allocation7 + $0x10] sm:$0xff]  ;;  %s369_s29 = sshll.u32 %s752_s28, 4  ;;  %s370_s29 = int_to_ptr.vmem [resolvable:$true] %s369_s29 }
  0x4c   :  { %v175_v10 = vld [vmem:[#allocation7] sm:$0xff]  ;;  %v176_v11 = vld [vmem:[#allocation7 + $0x8] sm:$0xff]  ;;  %v178_v13 = vld [vmem:[#allocation7 + $0x18] sm:$0xff]  ;;  %v546_v14 = vpack.c.bf16 %v86_v9, %v85_v8  ;;  %s713_s30 = scalar_lea.vmem %s370_s29, 128  ;;  %p718_p5 = scmp.lt.s32.totalorder %s370_s29, %s370_s29 }
  0x4d   :  { %541 = vmatpush3.bf16.msra.mxu0 %v540_v5  ;;  %v564_v15 = vpack.c.bf16 %v176_v11, %v175_v10  ;;  %v87_v16 = vld [vmem:[#allocation5 + $0x30] sm:$0xff]  ;;  %v88_v17 = vld [vmem:[#allocation5 + $0x38] sm:$0xff]  ;;  %v567_v18 = vpack.c.bf16 %v178_v13, %v177_v12  ;;  %v179_v19 = vld [vmem:[#allocation7 + $0x20] sm:$0xff]  ;;  %p714_p4 = scmp.ne.s32.totalorder %s370_s29, %s713_s30  ;;  %p719_p6 = scmp.lt.s32.totalorder %s713_s30, %s713_s30 }
  0x4e   :  { %542 = vmatprep.subr.bf16.mxu0 %v749_v0  ;;  %v180_v20 = vld [vmem:[#allocation7 + $0x28] sm:$0xff]  ;;  %v549_v21 = vpack.c.bf16 %v88_v17, %v87_v16  ;;  %v89_v22 = vld [vmem:[#allocation5 + $0x40] sm:$0xff]  ;;  %v181_v25 = vld [vmem:[#allocation7 + $0x30] sm:$0xff] }
  0x4f   :  { %565 = vmatpush3.bf16.msra.mxu1 %v564_v15  ;;  %v90_v23 = vld [vmem:[#allocation5 + $0x48] sm:$0xff]  ;;  %v570_v24 = vpack.c.bf16 %v180_v20, %v179_v19  ;;  %v182_v26 = vld [vmem:[#allocation7 + $0x38] sm:$0xff]  ;;  %v91_v28 = vld [vmem:[#allocation5 + $0x50] sm:$0xff]  ;;  %p720_p7 = por %p719_p6, %p718_p5 }
  0x50   :  { %566 = vmatprep.subr.bf16.mxu1 %v749_v0  ;;  %v552_v27 = vpack.c.bf16 %v90_v23, %v89_v22  ;;  %v92_v29 = vld [vmem:[#allocation5 + $0x58] sm:$0xff]  ;;  %v573_v30 = vpack.c.bf16 %v182_v26, %v181_v25  ;;  %v183_v31 = vld [vmem:[#allocation7 + $0x40] sm:$0xff]  ;;  %v184_v32 = vld [vmem:[#allocation7 + $0x48] sm:$0xff] }
  0x51   :  { %544 = vmatpush3.bf16.msra.mxu0 %v543_v7  ;;  %v555_v33 = vpack.c.bf16 %v92_v29, %v91_v28  ;;  %v93_v34 = vld [vmem:[#allocation5 + $0x60] sm:$0xff]  ;;  %v94_v35 = vld [vmem:[#allocation5 + $0x68] sm:$0xff]  ;;  %v576_v36 = vpack.c.bf16 %v184_v32, %v183_v31  ;;  %v95_v38 = vld [vmem:[#allocation5 + $0x70] sm:$0xff]  ;;  %p721_p8 = pnand %p720_p7, %p714_p4 }
  0x52   :  { %545 = vmatprep.subr.bf16.mxu0 %v749_v0  ;;  %v558_v37 = vpack.c.bf16 %v94_v35, %v93_v34  ;;  %v96_v39 = vld [vmem:[#allocation5 + $0x78] sm:$0xff]  ;;  %v185_v42 = vld [vmem:[#allocation7 + $0x50] sm:$0xff]  ;;  %v187_v45 = vld [vmem:[#allocation7 + $0x60] sm:$0xff] }
  0x53   :  { %568 = vmatpush3.bf16.msra.mxu1 %v567_v18  ;;  %v561_v40 = vpack.c.bf16 %v96_v39, %v95_v38  ;;  %v80_v41 = vld [vmem:[#allocation2] sm:$0xff]  ;;  %v188_v46 = vld [vmem:[#allocation7 + $0x68] sm:$0xff]  ;;  %v189_v48 = vld [vmem:[#allocation7 + $0x70] sm:$0xff] }
  0x54   :  { %569 = vmatprep.subr.bf16.mxu1 %v749_v0  ;;  %v186_v43 = vld [vmem:[#allocation7 + $0x58] sm:$0xff]  ;;  %v582_v47 = vpack.c.bf16 %v188_v46, %v187_v45  ;;  %v269_v51 = vld [vmem:[#allocation8] sm:$0xff]  ;;  %v270_v52 = vld [vmem:[#allocation8 + $0x8] sm:$0xff] }
  0x55   :  { %547 = vmatpush3.bf16.msra.mxu0 %v546_v14  ;;  %v579_v44 = vpack.c.bf16 %v186_v43, %v185_v42  ;;  %v190_v49 = vld [vmem:[#allocation7 + $0x78] sm:$0xff]  ;;  %v271_v53 = vld [vmem:[#allocation8 + $0x10] sm:$0xff]  ;;  %v588_v54 = vpack.c.bf16 %v270_v52, %v269_v51  ;;  %v273_v57 = vld [vmem:[#allocation8 + $0x20] sm:$0xff] }
  0x56   :  { %548 = vmatprep.subr.bf16.mxu0 %v749_v0  ;;  %v585_v50 = vpack.c.bf16 %v190_v49, %v189_v48  ;;  %v272_v55 = vld [vmem:[#allocation8 + $0x18] sm:$0xff]  ;;  %v274_v58 = vld [vmem:[#allocation8 + $0x28] sm:$0xff]  ;;  %v275_v60 = vld [vmem:[#allocation8 + $0x30] sm:$0xff] }
  0x57   :  { %571 = vmatpush3.bf16.msra.mxu1 %v570_v24  ;;  %v591_v56 = vpack.c.bf16 %v272_v55, %v271_v53  ;;  %v594_v59 = vpack.c.bf16 %v274_v58, %v273_v57  ;;  %v276_v61 = vld [vmem:[#allocation8 + $0x38] sm:$0xff]  ;;  %v277_v63 = vld [vmem:[#allocation8 + $0x40] sm:$0xff]  ;;  %v279_v8 = vld [vmem:[#allocation8 + $0x50] sm:$0xff] }
  0x58   :  { %572 = vmatprep.subr.bf16.mxu1 %v749_v0  ;;  %v597_v62 = vpack.c.bf16 %v276_v61, %v275_v60  ;;  %v380_v3 = vld [vmem:[%s903_s2] ss:$0 sm:$0xff]  ;;  %v281_v11 = vld [vmem:[#allocation8 + $0x60] sm:$0xff]  ;;  %v282_v12 = vld [vmem:[#allocation8 + $0x68] sm:$0xff] }
  0x59   :  { %550 = vmatpush3.bf16.msra.mxu0 %v549_v21  ;;  %v280_v9 = vld [vmem:[#allocation8 + $0x58] sm:$0xff]  ;;  %v606_v13 = vpack.c.bf16 %v282_v12, %v281_v11  ;;  %v283_v14 = vld [vmem:[#allocation8 + $0x70] sm:$0xff] }
  0x5a   :  { %551 = vmatprep.subr.bf16.mxu0 %v749_v0  ;;  %v603_v10 = vpack.c.bf16 %v280_v9, %v279_v8  ;;  %v284_v15 = vld [vmem:[#allocation8 + $0x78] sm:$0xff] }
  0x5b   :  { %574 = vmatpush3.bf16.msra.mxu1 %v573_v30  ;;  %v609_v16 = vpack.c.bf16 %v284_v15, %v283_v14  ;;  %v381_v17 = vld [vmem:[%s905_s4] ss:$0 sm:$0xff] }
  0x5c   :  { %575 = vmatprep.subr.bf16.mxu1 %v749_v0  ;;  %v382_v22 = vld [vmem:[%s907_s6] ss:$0 sm:$0xff] }
  0x5d   :  { %553 = vmatpush3.bf16.msra.mxu0 %v552_v27 }
  0x5e   :  { %554 = vmatprep.subr.bf16.mxu0 %v749_v0 }
  0x5f   :  { %577 = vmatpush3.bf16.msra.mxu1 %v576_v36 }
  0x60   :  { %578 = vmatprep.subr.bf16.mxu1 %v749_v0 }
  0x61   :  { %556 = vmatpush3.bf16.msra.mxu0 %v555_v33 }
  0x62   :  { %557 = vmatprep.subr.bf16.mxu0 %v749_v0 }
  0x63   :  { %580 = vmatpush3.bf16.msra.mxu1 %v579_v44 }
  0x64   :  { %581 = vmatprep.subr.bf16.mxu1 %v749_v0 }
  0x65   :  { %559 = vmatpush3.bf16.msra.mxu0 %v558_v37 }
  0x66   :  { %560 = vmatprep.subr.bf16.mxu0 %v749_v0 }
  0x67   :  { %583 = vmatpush3.bf16.msra.mxu1 %v582_v47 }
  0x68   :  { %584 = vmatprep.subr.bf16.mxu1 %v749_v0 }
  0x69   :  { %562 = vmatpush3.bf16.msra.mxu0 %v561_v40 }
  0x6a   :  { %587 = vmatprep.subr.bf16.mxu0 %v749_v0 }
  0x6b   :  { %586 = vmatpush3.bf16.msra.mxu1 %v585_v50 }
  0x6c   :  { %467 = vmatmul.mubr.f32.vlgmr.msra.gmra.mrb[0].mxu0 %v80_v41 }
  0x6d   :  { %536 = vmatprep.mubr.msk.f32.mxu0 %vm750_vm0, %v751_v1  ;;  %589 = vmatpush3.bf16.msra.mxu0 %v588_v54  ;;  %v278_v1 = vld [vmem:[#allocation8 + $0x48] sm:$0xff] }
  0x6e   :  { %590 = vmatprep.subr.bf16.mxu0 %v749_v0  ;;  %v600_v2 = vpack.c.bf16 %v278_v1, %v277_v63 }
  0x71   :  { %592 = vmatpush3.bf16.msra.mxu0 %v591_v56 }
  0x72   :  { %593 = vmatprep.subr.bf16.mxu0 %v749_v0 }
  0x75   :  { %595 = vmatpush3.bf16.msra.mxu0 %v594_v59 }
  0x76   :  { %596 = vmatprep.subr.bf16.mxu0 %v749_v0 }
  0x79   :  { %598 = vmatpush3.bf16.msra.mxu0 %v597_v62 }
  0x7a   :  { %599 = vmatprep.subr.bf16.mxu0 %v749_v0 }
  0x7d   :  { %601 = vmatpush3.bf16.msra.mxu0 %v600_v2 }
  0x7e   :  { %602 = vmatprep.subr.bf16.mxu0 %v749_v0 }
  0x81   :  { %604 = vmatpush3.bf16.msra.mxu0 %v603_v10 }
  0x82   :  { %605 = vmatprep.subr.bf16.mxu0 %v749_v0 }
  0x85   :  { %607 = vmatpush3.bf16.msra.mxu0 %v606_v13 }
  0x86   :  { %608 = vmatprep.subr.bf16.mxu0 %v749_v0 }
  0x89   :  { %610 = vmatpush3.bf16.msra.mxu0 %v609_v16 }
 0x13f   :  { %v170_v4 = vpop.f32.mrb[0].mxu0 }
 0x140   :  { %v171_v5 = vadd.f32 %v380_v3, %v170_v4  ;;  %v468_v6 = vpop.f32.mrb[1].mxu0 }
 0x142   :  { %621 = vtanh.f32 %v171_v5 }
 0x14c   :  { %v622_v7 = vpop.eup %621 }
 0x14d   :  { %502 = vmatmul.mubr.f32.vlgmr.msra.gmra.mrb[0].mxu1 %v622_v7 }
 0x220   :  { %v264_v18 = vpop.f32.mrb[0].mxu1 }
 0x221   :  { %v265_v19 = vadd.f32 %v381_v17, %v264_v18  ;;  %v503_v20 = vpop.f32.mrb[1].mxu1 }
 0x223   :  { %623 = vtanh.f32 %v265_v19 }
 0x22d   :  { %v624_v21 = vpop.eup %623 }
 0x22e   :  { %537 = vmatmul.mubr.f32.vlgmr.msra.gmra.mrb[2].mxu0 %v624_v21 }
 0x301   :  { %v358_v23 = vpop.f32.mrb[2].mxu0 }
 0x302   :  { %v359_v24 = vadd.f32 %v382_v22, %v358_v23  ;;  %v538_v0 = vpop.f32.mrb[3].mxu0 }
 0x304   :  { %362 = vst [vmem:[#allocation10] sm:$0xff] %v359_v24 }
 0x305   :  { %724 = shalt.err (!%p721_p8)
}
 0x306   :  { %s725_s9 = scalar_lea.hbm %s908_s7, 128 }
 0x307   :  { %p726_p9 = scmp.ne.s32.totalorder %s908_s7, %s725_s9  ;;  %p729_p10 = scmp.lt.u32.totalorder %s725_s9, %s908_s7 }
 0x309   :  { %p731_p11 = pnand %p729_p10, %p726_p9 }
 0x30b   :  { %734 = shalt.err (!%p731_p11)
}
 0x30c   :  { %372 = dma.vmem_to_hbm [thread:$0]  %s370_s29, 128, %s908_s7, [#allocation4]  }
 0x30d   :  { %741 = dma.done.wait [#allocation4], 128  }
 0x30e   :  { %742 = vsyncadd [#allocation4], 4294967168 }
 0x30f   :  { %376 = vsyncpa [#allocation3], 1 }
 0x310   :  { %377 = vsyncpa [#allocation6], 1 }
 0x311   :  { %378 = vsyncpa [#allocation9], 1 }
 0x312   :  { %379 = vsyncpa [#allocation4], 1 }

</bundles_post_ra>
